<compile_context>
chip_gen: v5e
topology: v5e:2x2
jax: 0.10.0
libtpu: 0.0.40
codegen_flags: <defaults>
</compile_context>

<pallas_src>
import functools

import jax
import jax.numpy as jnp
from jax.experimental import pallas as pl
from jax.experimental.pallas import tpu as pltpu


# ------------------------------ kernel helpers ------------------------------

def _causal_dilated_conv(h, w, bias, *, kernel_size, dilation):
    """One causal dilated conv as a single batched MXU contraction.

    h    : (bn, c, L)   compute dtype
    w    : (R, K*c)     compute dtype, columns ordered (tap k major, channel minor)
    bias : (R, 1)       float32
    returns (bn, R, L)  float32
    """
    bn, c, l = h.shape
    k = kernel_size
    pad = (k - 1) * dilation
    # Left-extend with a lane-aligned block of zeros; tap kk then reads the
    # window shifted right by s_kk = (k-1-kk)*dilation, with exact zeros in the
    # causal-padding region (no masks, no data-dependent constants).
    pad_aligned = ((pad + 127) // 128) * 128 if pad else 0
    if pad_aligned:
        hp = jnp.concatenate(
            [jnp.zeros((bn, c, pad_aligned), h.dtype), h], axis=-1)
    else:
        hp = h
    taps = []
    for kk in range(k):
        start = pad_aligned - (k - 1 - kk) * dilation
        taps.append(hp[:, :, start:start + l])
    rhs = taps[0] if k == 1 else jnp.concatenate(taps, axis=1)   # (bn, K*c, L)
    wb = jnp.broadcast_to(w, (bn,) + w.shape)                    # (bn, R, K*c)
    out = jnp.einsum("bok,bkl->bol", wb, rhs,
                     preferred_element_type=jnp.float32)
    return out + bias[None, :, :]


def _temporal_block_last_kernel(x_ref, w1_ref, b1_ref, w2_ref, b2_ref, o_ref, *,
                                kernel_size, dilation, c_out, fused_residual,
                                compute_dtype):
    # x_ref : (bn, c_in, L)        input dtype (f32)
    # w1_ref: (R1, K*c_in)         conv1 weight (+ fused 1x1 downsample rows)
    # b1_ref: (R1, 1) f32          [b1] or [b1; bd]
    # w2_ref: (c_out, K*c_out)
    # b2_ref: (c_out, 1) f32
    # o_ref : (bn, c_out, L)
    x = x_ref[...]
    h0 = x.astype(compute_dtype)

    # conv1 -> chomp1 -> dropout1 (identity at inference), with the optional
    # 1x1 downsample fused as extra output rows reading the unshifted tap.
    big = _causal_dilated_conv(h0, w1_ref[...], b1_ref[...],
                               kernel_size=kernel_size, dilation=dilation)
    h1 = big[:, :c_out, :]                       # (bn, c_out, L) f32
    if fused_residual:
        res = big[:, c_out:, :]                  # downsample(x), f32 accumulate
    else:
        res = x.astype(jnp.float32)              # identity residual, exact f32
    # TODO(synk): nn.Dropout is identity at inference; training-mode dropout
    # masks are not implemented.

    # conv2 -> chomp2 -> dropout2 (identity at inference)
    h2 = _causal_dilated_conv(h1.astype(compute_dtype), w2_ref[...], b2_ref[...],
                              kernel_size=kernel_size, dilation=dilation)

    # TemporalBlockLast applies NO ReLU in its forward path.
    o_ref[...] = (h2 + res).astype(o_ref.dtype)


# --------------------------------- wrapper ----------------------------------

_STEP_TARGET_BYTES = 1 << 20   # ~1 MiB of (input + output) HBM bytes per step


def _pick_batch_group(n, per_elem_bytes):
    """Largest divisor of n with bn*per_elem_bytes <= target, keeping >= 2 grid
    steps whenever n >= 2 (the parallel axis is sharded over v7x's 2 TCs)."""
    best = 1
    for d in range(1, n + 1):
        if n % d:
            continue
        if d * per_elem_bytes > _STEP_TARGET_BYTES:
            break
        if n >= 2 and n // d < 2:
            break
        best = d
    return best


def temporal_block_last_pallas(x, w1, b1, w2, b2, wd, bd, *, kernel_size,
                               dilation, stride=1, padding=None,
                               compute_dtype=jnp.bfloat16, out_dtype=None):
    """Forward pass of TemporalBlockLast.

    x: (N, C_in, L). Returns (N, C_out, L) in `out_dtype` (default: x.dtype).
    wd/bd may be None when n_inputs == n_outputs (identity residual).
    """
    if stride != 1:
        # TODO(synk): strided causal conv not implemented (standard TCN uses 1).
        raise NotImplementedError("stride != 1 is not supported")
    n, c_in, l = x.shape
    c_out, _, k = w1.shape
    assert k == kernel_size
    pad = (kernel_size - 1) * dilation
    if padding is not None and padding != pad:
        # TODO(synk): only the causal padding=(K-1)*dilation + Chomp1d(padding)
        # configuration (standard TCN, output length == L) is handled.
        raise NotImplementedError("padding must equal (kernel_size-1)*dilation")
    out_dtype = x.dtype if out_dtype is None else out_dtype
    fused_residual = wd is not None

    # ---- one-time (tiny) weight prep: im2col column order (tap-major), 1x1
    #      downsample fused as extra output rows of conv1 when present --------
    w1r = jnp.transpose(w1, (0, 2, 1)).reshape(c_out, k * c_in)
    if fused_residual:
        wd_rows = jnp.concatenate(
            [jnp.zeros((c_out, (k - 1) * c_in), w1.dtype), wd.astype(w1.dtype)],
            axis=1)                               # residual reads unshifted tap
        w1c = jnp.concatenate([w1r, wd_rows], axis=0)
        b1c = jnp.concatenate([b1, bd]).reshape(2 * c_out, 1)
    else:
        w1c = w1r
        b1c = b1.reshape(c_out, 1)
    w1c = w1c.astype(compute_dtype)
    b1c = b1c.astype(jnp.float32)
    w2c = (jnp.transpose(w2, (0, 2, 1))
           .reshape(c_out, k * c_out).astype(compute_dtype))
    b2c = b2.astype(jnp.float32).reshape(c_out, 1)
    r1 = w1c.shape[0]

    # ---- adaptive batch grouping over the (N, C, L) layout -------------------
    out_itemsize = jnp.dtype(out_dtype).itemsize
    per_elem = l * (c_in * x.dtype.itemsize + c_out * out_itemsize)
    bn = _pick_batch_group(n, per_elem)
    grid = (n // bn,)
    # TODO(synk): for very long L additionally tile the time axis with a
    # (kernel_size-1)*dilation halo so a single step fits v7x's 64 MiB VMEM.

    # Per-step VMEM footprint estimate (double-buffered I/O + intermediates).
    cd_bytes = jnp.dtype(compute_dtype).itemsize
    step_bytes = (2 * bn * c_in * l * x.dtype.itemsize
                  + 2 * bn * c_out * l * out_itemsize
                  + bn * l * k * (c_in + c_out) * cd_bytes        # taps
                  + bn * l * (r1 + 2 * c_out) * 4                 # f32 activations
                  + 2 * (w1c.size + w2c.size) * cd_bytes)
    vmem_limit = int(min(max(2 * step_bytes + (4 << 20), 32 << 20), 64 << 20))

    kernel = functools.partial(
        _temporal_block_last_kernel, kernel_size=k, dilation=dilation,
        c_out=c_out, fused_residual=fused_residual, compute_dtype=compute_dtype)

    return pl.pallas_call(
        kernel,
        out_shape=jax.ShapeDtypeStruct((n, c_out, l), out_dtype),
        grid=grid,
        in_specs=[
            pl.BlockSpec((bn, c_in, l), lambda i: (i, 0, 0)),
            pl.BlockSpec((r1, k * c_in), lambda i: (0, 0)),
            pl.BlockSpec((r1, 1), lambda i: (0, 0)),
            pl.BlockSpec((c_out, k * c_out), lambda i: (0, 0)),
            pl.BlockSpec((c_out, 1), lambda i: (0, 0)),
        ],
        out_specs=pl.BlockSpec((bn, c_out, l), lambda i: (i, 0, 0)),
        compiler_params=pltpu.CompilerParams(
            dimension_semantics=("parallel",),
            vmem_limit_bytes=vmem_limit),
    )(x, w1c, b1c, w2c, b2c)


# -------------------- weight-norm helper + pure-JAX reference ---------------

def weight_norm_weight(v, g):
    """PyTorch weight_norm (dim=0): w = g * v / ||v|| per output channel."""
    norm = jnp.sqrt(jnp.sum(v * v, axis=(1, 2), keepdims=True))
    return (g[:, None, None] / norm) * v


def _conv1d_ref(x, w, b, dilation, padding):
    out = jax.lax.conv_general_dilated(
        x, w, window_strides=(1,), padding=[(padding, padding)],
        rhs_dilation=(dilation,), dimension_numbers=("NCH", "OIH", "NCH"),
        precision=jax.lax.Precision.HIGHEST)
    return out + b[None, :, None]


def temporal_block_last_ref(x, w1, b1, w2, b2, wd, bd, *, kernel_size,
                            dilation):
    """Pure-JAX mirror of TemporalBlockLast.forward (no ReLUs, dropout=id)."""
    pad = (kernel_size - 1) * dilation
    h = _conv1d_ref(x, w1, b1, dilation, pad)
    h = h[:, :, :-pad] if pad else h                         # chomp1
    h = _conv1d_ref(h, w2, b2, dilation, pad)
    h = h[:, :, :-pad] if pad else h                         # chomp2
    res = x if wd is None else _conv1d_ref(x, wd[:, :, None], bd, 1, 0)
    return h + res


# ----------------------------------- demo -----------------------------------

if __name__ == "__main__":
    def make_params(key, c_in, c_out, k, *, downsample):
        ks = jax.random.split(key, 8)
        v1 = 0.01 * jax.random.normal(ks[0], (c_out, c_in, k), jnp.float32)
        g1 = 0.5 + jnp.abs(jax.random.normal(ks[1], (c_out,), jnp.float32))
        v2 = 0.01 * jax.random.normal(ks[2], (c_out, c_out, k), jnp.float32)
        g2 = 0.5 + jnp.abs(jax.random.normal(ks[3], (c_out,), jnp.float32))
        w1 = weight_norm_weight(v1, g1)
        w2 = weight_norm_weight(v2, g2)
        b1 = 0.1 * jax.random.normal(ks[4], (c_out,), jnp.float32)
        b2 = 0.1 * jax.random.normal(ks[5], (c_out,), jnp.float32)
        if downsample:
            wd = 0.01 * jax.random.normal(ks[6], (c_out, c_in), jnp.float32)
            bd = 0.1 * jax.random.normal(ks[7], (c_out,), jnp.float32)
        else:
            wd, bd = None, None
        return w1, b1, w2, b2, wd, bd

    key = jax.random.PRNGKey(0)
    k1, k2, k3, k4 = jax.random.split(key, 4)

    # --- config 1: c_in != c_out -> fused 1x1 downsample residual -----------
    N, C_IN, C_OUT, L, K, DIL = 2, 4, 8, 16, 3, 2
    x = jax.random.normal(k1, (N, C_IN, L), jnp.float32)
    params = make_params(k2, C_IN, C_OUT, K, downsample=True)
    ref = temporal_block_last_ref(x, *params, kernel_size=K, dilation=DIL)

    # f32 compute path: validates the tap construction / fusion exactly
    out_f32 = jax.block_until_ready(temporal_block_last_pallas(
        x, *params, kernel_size=K, dilation=DIL, compute_dtype=jnp.float32))
    assert out_f32.shape == (N, C_OUT, L)
    assert jnp.allclose(out_f32, ref, atol=2e-3, rtol=2e-3), (
        float(jnp.max(jnp.abs(out_f32 - ref))))

    # bf16 MXU path (production default): looser tolerance vs f32 reference
    out_bf16 = jax.block_until_ready(temporal_block_last_pallas(
        x, *params, kernel_size=K, dilation=DIL, compute_dtype=jnp.bfloat16))
    assert jnp.allclose(out_bf16, ref, atol=1e-1, rtol=1e-1), (
        float(jnp.max(jnp.abs(out_bf16 - ref))))

    # --- config 2: identity residual (c_in == c_out), batch groups bn=3 -----
    N2, C2, L2, DIL2 = 6, 8, 128, 4
    x2 = jax.random.normal(k3, (N2, C2, L2), jnp.float32)
    params2 = make_params(k4, C2, C2, K, downsample=False)
    ref2 = temporal_block_last_ref(x2, *params2, kernel_size=K, dilation=DIL2)
    out2 = jax.block_until_ready(temporal_block_last_pallas(
        x2, *params2, kernel_size=K, dilation=DIL2, compute_dtype=jnp.float32))
    assert out2.shape == (N2, C2, L2)
    assert jnp.allclose(out2, ref2, atol=2e-3, rtol=2e-3), (
        float(jnp.max(jnp.abs(out2 - ref2))))

    print("KERNEL_OK")
</pallas_src>

<mosaic_0001>
module attributes {stable_mosaic.version = 11 : i64} {
  func.func @_temporal_block_last_kernel(%arg0: i32, %arg1: memref<1x4x16xf32, #tpu.memory_space<vmem>>, %arg2: memref<16x12xf32, #tpu.memory_space<vmem>>, %arg3: memref<16x1xf32, #tpu.memory_space<vmem>>, %arg4: memref<8x24xf32, #tpu.memory_space<vmem>>, %arg5: memref<8x1xf32, #tpu.memory_space<vmem>>, %arg6: memref<1x8x16xf32, #tpu.memory_space<vmem>>) attributes {dimension_semantics = [#tpu.dimension_semantics<parallel>], iteration_bounds = array<i64: 2>, scalar_prefetch = 0 : i64, scratch_operands = 0 : i64, tpu.core_type = #tpu.core_type<tc>, window_params = [{transform_indices = @transform_0, window_bounds = array<i64: 1, 4, 16>}, {pipeline_mode = #tpu.pipeline_mode<synchronous>, transform_indices = @transform_1, window_bounds = array<i64: 16, 12>}, {pipeline_mode = #tpu.pipeline_mode<synchronous>, transform_indices = @transform_2, window_bounds = array<i64: 16, 1>}, {pipeline_mode = #tpu.pipeline_mode<synchronous>, transform_indices = @transform_3, window_bounds = array<i64: 8, 24>}, {pipeline_mode = #tpu.pipeline_mode<synchronous>, transform_indices = @transform_4, window_bounds = array<i64: 8, 1>}, {transform_indices = @transform_5, window_bounds = array<i64: 1, 8, 16>}]} {
    %c0 = arith.constant 0 : index
    %c0_0 = arith.constant 0 : index
    %c0_1 = arith.constant 0 : index
    %0 = vector.load %arg1[%c0, %c0_0, %c0_1] : memref<1x4x16xf32, #tpu.memory_space<vmem>>, vector<1x4x16xf32>
    %c0_2 = arith.constant 0 : index
    %c0_3 = arith.constant 0 : index
    %1 = vector.load %arg2[%c0_2, %c0_3] : memref<16x12xf32, #tpu.memory_space<vmem>>, vector<16x12xf32>
    %c0_4 = arith.constant 0 : index
    %c0_5 = arith.constant 0 : index
    %2 = vector.load %arg3[%c0_4, %c0_5] : memref<16x1xf32, #tpu.memory_space<vmem>>, vector<16x1xf32>
    %cst = arith.constant 0.000000e+00 : f32
    %3 = vector.broadcast %cst : f32 to vector<1x4x128xf32>
    %4 = tpu.concatenate %3, %0 in 2 : vector<1x4x128xf32>, vector<1x4x16xf32> -> vector<1x4x144xf32>
    %5 = vector.extract_strided_slice %4 {offsets = [0, 0, 124], sizes = [1, 4, 16], strides = [1, 1, 1]} : vector<1x4x144xf32> to vector<1x4x16xf32>
    %6 = vector.extract_strided_slice %4 {offsets = [0, 0, 126], sizes = [1, 4, 16], strides = [1, 1, 1]} : vector<1x4x144xf32> to vector<1x4x16xf32>
    %7 = vector.extract_strided_slice %4 {offsets = [0, 0, 128], sizes = [1, 4, 16], strides = [1, 1, 1]} : vector<1x4x144xf32> to vector<1x4x16xf32>
    %8 = tpu.concatenate %5, %6, %7 in 1 : vector<1x4x16xf32>, vector<1x4x16xf32>, vector<1x4x16xf32> -> vector<1x12x16xf32>
    %9 = vector.shape_cast %1 : vector<16x12xf32> to vector<1x16x12xf32>
    "tpu.trace_start"() <{level = 10 : i32, message = "bok,bkl->bol"}> : () -> ()
    %cst_6 = arith.constant dense<0.000000e+00> : vector<1x16x16xf32>
    %10 = tpu.matmul %9, %8, %cst_6 {dimension_numbers = #tpu.dot_dimension_numbers<[2], [1], [1], [2], [0, 0, 0, 1, 1, 2], [0], [0]>} : vector<1x16x12xf32>, vector<1x12x16xf32>, vector<1x16x16xf32> -> vector<1x16x16xf32>
    "tpu.trace_stop"() : () -> ()
    %11 = vector.shape_cast %2 : vector<16x1xf32> to vector<1x16x1xf32>
    %12 = vector.broadcast %11 : vector<1x16x1xf32> to vector<1x16x16xf32>
    %13 = arith.addf %10, %12 : vector<1x16x16xf32>
    %14 = vector.extract_strided_slice %13 {offsets = [0, 0, 0], sizes = [1, 8, 16], strides = [1, 1, 1]} : vector<1x16x16xf32> to vector<1x8x16xf32>
    %15 = vector.extract_strided_slice %13 {offsets = [0, 8, 0], sizes = [1, 8, 16], strides = [1, 1, 1]} : vector<1x16x16xf32> to vector<1x8x16xf32>
    %c0_7 = arith.constant 0 : index
    %c0_8 = arith.constant 0 : index
    %16 = vector.load %arg4[%c0_7, %c0_8] : memref<8x24xf32, #tpu.memory_space<vmem>>, vector<8x24xf32>
    %c0_9 = arith.constant 0 : index
    %c0_10 = arith.constant 0 : index
    %17 = vector.load %arg5[%c0_9, %c0_10] : memref<8x1xf32, #tpu.memory_space<vmem>>, vector<8x1xf32>
    %cst_11 = arith.constant 0.000000e+00 : f32
    %18 = vector.broadcast %cst_11 : f32 to vector<1x8x128xf32>
    %19 = tpu.concatenate %18, %14 in 2 : vector<1x8x128xf32>, vector<1x8x16xf32> -> vector<1x8x144xf32>
    %20 = vector.extract_strided_slice %19 {offsets = [0, 0, 124], sizes = [1, 8, 16], strides = [1, 1, 1]} : vector<1x8x144xf32> to vector<1x8x16xf32>
    %21 = vector.extract_strided_slice %19 {offsets = [0, 0, 126], sizes = [1, 8, 16], strides = [1, 1, 1]} : vector<1x8x144xf32> to vector<1x8x16xf32>
    %22 = vector.extract_strided_slice %19 {offsets = [0, 0, 128], sizes = [1, 8, 16], strides = [1, 1, 1]} : vector<1x8x144xf32> to vector<1x8x16xf32>
    %23 = tpu.concatenate %20, %21, %22 in 1 : vector<1x8x16xf32>, vector<1x8x16xf32>, vector<1x8x16xf32> -> vector<1x24x16xf32>
    %24 = vector.shape_cast %16 : vector<8x24xf32> to vector<1x8x24xf32>
    "tpu.trace_start"() <{level = 10 : i32, message = "bok,bkl->bol"}> : () -> ()
    %cst_12 = arith.constant dense<0.000000e+00> : vector<1x8x16xf32>
    %25 = tpu.matmul %24, %23, %cst_12 {dimension_numbers = #tpu.dot_dimension_numbers<[2], [1], [1], [2], [0, 0, 0, 1, 1, 2], [0], [0]>} : vector<1x8x24xf32>, vector<1x24x16xf32>, vector<1x8x16xf32> -> vector<1x8x16xf32>
    "tpu.trace_stop"() : () -> ()
    %26 = vector.shape_cast %17 : vector<8x1xf32> to vector<1x8x1xf32>
    %27 = vector.broadcast %26 : vector<1x8x1xf32> to vector<1x8x16xf32>
    %28 = arith.addf %25, %27 : vector<1x8x16xf32>
    %29 = arith.addf %28, %15 : vector<1x8x16xf32>
    %c0_13 = arith.constant 0 : index
    %c0_14 = arith.constant 0 : index
    %c0_15 = arith.constant 0 : index
    %30 = vector.load %arg6[%c0_13, %c0_14, %c0_15] : memref<1x8x16xf32, #tpu.memory_space<vmem>>, vector<1x8x16xf32>
    tpu.vector_store %arg6[%c0_13, %c0_14, %c0_15], %29 {strides = array<i32>} : memref<1x8x16xf32, #tpu.memory_space<vmem>>, vector<1x8x16xf32>,
    return
  }
  func.func @transform_0(%arg0: i32) -> (i32, i32, i32) {
    %c0_i32 = arith.constant 0 : i32
    %c0_i32_0 = arith.constant 0 : i32
    %c0_i32_1 = arith.constant 0 : i32
    return %arg0, %c0_i32, %c0_i32_0 : i32, i32, i32
  }
  func.func @transform_1(%arg0: i32) -> (i32, i32) {
    %c0_i32 = arith.constant 0 : i32
    %c0_i32_0 = arith.constant 0 : i32
    %c0_i32_1 = arith.constant 0 : i32
    return %c0_i32, %c0_i32_0 : i32, i32
  }
  func.func @transform_2(%arg0: i32) -> (i32, i32) {
    %c0_i32 = arith.constant 0 : i32
    %c0_i32_0 = arith.constant 0 : i32
    %c0_i32_1 = arith.constant 0 : i32
    return %c0_i32, %c0_i32_0 : i32, i32
  }
  func.func @transform_3(%arg0: i32) -> (i32, i32) {
    %c0_i32 = arith.constant 0 : i32
    %c0_i32_0 = arith.constant 0 : i32
    %c0_i32_1 = arith.constant 0 : i32
    return %c0_i32, %c0_i32_0 : i32, i32
  }
  func.func @transform_4(%arg0: i32) -> (i32, i32) {
    %c0_i32 = arith.constant 0 : i32
    %c0_i32_0 = arith.constant 0 : i32
    %c0_i32_1 = arith.constant 0 : i32
    return %c0_i32, %c0_i32_0 : i32, i32
  }
  func.func @transform_5(%arg0: i32) -> (i32, i32, i32) {
    %c0_i32 = arith.constant 0 : i32
    %c0_i32_0 = arith.constant 0 : i32
    %c0_i32_1 = arith.constant 0 : i32
    return %arg0, %c0_i32, %c0_i32_0 : i32, i32, i32
  }
}

</mosaic_0001>

<bundles_post_ra>
// kernel: tpu_custom_call.1
= control target key start
LH: loop header
LB: loop body
LE: loop exit
PB: predicated region body
PF: predicated region fallthrough
CT: control target
= control target key end

     0   :  { %10 = vsyncpa [#allocation3], 0  ;;  %s809_s0 = inlined_call_operand.vmem [shape: f32[2,4,16], index: 0, kind: input, shape index: {}]   ;;  %s810_s1 = inlined_call_operand.vmem [shape: f32[16,12], index: 1, kind: input, shape index: {}]   ;;  %s811_s2 = inlined_call_operand.vmem [shape: f32[16,1], index: 2, kind: input, shape index: {}]   ;;  %s812_s3 = inlined_call_operand.hbm [shape: f32[8,24], index: 3, kind: input, shape index: {}]   ;;  %s813_s4 = inlined_call_operand.vmem [shape: f32[8,1], index: 4, kind: input, shape index: {}]   ;;  %s814_s5 = inlined_call_operand.hbm [shape: f32[2,8,16], index: 5, kind: output, shape index: {}]  }
   0x1   :  { %11 = vsyncpa [#allocation4], 0 }
   0x2   :  { %13 = vsyncpa [#allocation4 + $0x1], 0  ;;  %s689_s18 = smov 0   ;;  %s691_s19 = smov 0  }
   0x3   :  { %s693_s20 = smov 0   ;;  %s695_s21 = smov 0  }
   0x4 LB: > { %s710_s22 = sadd.s32 4294967295, %s651_s21   ;;  %s454_s23 = sadd.s32 4294967294, %s651_s21   ;;  %s651_s21 = sphi %s695_s21, %s820_s21   ;;  %s647_s20 = sphi %s693_s20, %s819_s20   ;;  %s643_s19 = sphi %s691_s19, %s818_s19   ;;  %s639_s18 = sphi %s689_s18, %s817_s18  }
   0x5   : > { %s714_s24 = sadd.s32 1, %s651_s21   ;;  %s136_s25 = sadd.s32 1, %s647_s20 }
   0x6   : > { %s133_s26 = ssub.s32 %s651_s21, %s714_s24  ;;  %p146_p0 = scmp.ne.s32.totalorder %s647_s20, %s643_s19 }
   0x7   : > { %p134_p1 = scmp.eq.s32.totalorder %s133_s26, 0  ;;  %p147_p2 = scmp.eq.s32.totalorder %s710_s22, 1 }
   0x8   : > { %p152_p3 = scmp.ne.s32.totalorder %s643_s19, %s639_s18  ;;  %p153_p4 = scmp.eq.s32.totalorder %s454_s23, 1 }
   0x9   : > { %s725_s27 = scalar_select %p134_p1, %s647_s20, %s136_s25  }
   0xa   : > { %p727_p5 = por %p147_p2, %p146_p0  ;;  %p731_p6 = por %p153_p4, %p152_p3 }
   0xb   : > { %p455_p7 = scmp.ge.s32.totalorder %s651_s21, 1  ;;  %p160_p8 = scmp.lt.s32.totalorder %s651_s21, 3 }
   0xc   : > { %p486_p9 = scmp.eq.s32.totalorder %s710_s22, 0  ;;  %s178_s7 = sshll.u32 %s812_s3, 4  ;;  %s179_s7 = int_to_ptr.hbm [resolvable:$true] %s178_s7 }
   0xd   : > { %p161_p10 = pnand %p455_p7, %p160_p8  ;;  %s653_s8 = smov [#allocation2]  }
   0xe   : > { %s180_s9 = sshll.u32 %s653_s8, 4  ;;  %s181_s9 = int_to_ptr.vmem [resolvable:$true] %s180_s9 }
   0xf   : > { %p478_p11 = pneg %p161_p10  ;;  %203 = sbr.rel (%p161_p10) target bundleno = 782 (0x30e), region = 40 }
  0x11   : > { %p479_p12 = pnand %p486_p9, %p478_p11 }
  0x13   : > { %481 = dma.hbm_to_vmem [thread:$0]  (!%p479_p12), %s179_s7, 128, %s181_s9, [#allocation3]  }
  0x14   : > { %630 = dma.done.wait (%p486_p9), [#allocation3], 128  }
  0x15   : > { %632 = vsyncadd (%p486_p9), [#allocation3], 4294967168  ;;  %p231_p13 = scmp.lt.s32.totalorder %s710_s22, 1  ;;  %v654_v0 = vmov 0.0   ;;  %s655_s15 = smov 126   ;;  %vm248_vm0 = vcmask 1031168  }
  0x16   : > { %v242_v1 = vrot.slane %v654_v0, 4  ;;  %s656_s16 = smov 124   ;;  %s657_s17 = smov 4   ;;  %vm254_vm1 = vcmask 1043456   ;;  %v238_v13 = vld [vmem:[%s811_s2] sm:$0xff]  ;;  %v658_v14 = vmov 0  }
  0x17   : > { %s232_s10 = scalar_select %p231_p13, %s710_s22, 1  ;;  %537 = vset.pattern.permute.xlu2 %v658_v14  ;;  %553 = vset.pattern.permute.xlu1 %v658_v14  ;;  %vm275_vm2 = vcmask 31744   ;;  %v236_v19 = vld [vmem:[%s810_s1] sm:$0xff]  ;;  %vm278_vm3 = vcmask 97280   ;;  %v237_v33 = vld [vmem:[%s810_s1 + $0x8] sm:$0xff]  ;;  %vm340_vm4 = vcmask 195584  }
  0x18   : > { %259 = vperm.xlu2 %537, %v238_v13   ;;  %554 = vset.pattern.permute.xlu0 %v658_v14  ;;  %v311_v28 = vld [vmem:[%s813_s4] sm:$0xff]  ;;  %v239_v34 = vld [vmem:[%s811_s2 + $0x8] sm:$0xff]  ;;  %s228_s12 = sand.u32 1, %s643_s19   ;;  %vm365_vm5 = vcmask 130048   ;;  %s605_s9 = scalar_lea.hbm %s814_s5, 16 }
  0x19   : > { %s461_s11 = sshll.u32 %s232_s10, 2  ;;  %v310_v43 = vld [vmem:[#allocation2] sm:$0xff]  ;;  %s460_s13 = sshll.u32 %s228_s12, 3 }
  0x1a   : > { %s234_s14 = scalar_lea.vmem %s809_s0, %s461_s11  ;;  %s230_s23 = scalar_lea.vmem [#allocation5], %s460_s13 }
  0x1b   : > { %v235_v2 = vld [vmem:[%s234_s14] sm:$0xf]  ;;  %s467_s14 = sshll.u32 %s710_s22, 3  ;;  %s380_s25 = sshll.u32 %s230_s23, 4  ;;  %s381_s25 = int_to_ptr.vmem [resolvable:$true] %s380_s25 }
  0x1c   : > { %v243_v3 = vrot.slane %v235_v2, 4  ;;  %s368_s22 = scalar_lea.sflag [#allocation4], %s228_s12 }
  0x1e   : > { %v527_v4 = vpack.i.bf16 %v243_v3, %v242_v1 }
  0x20   : > { %528 = vrot.lane.b32.xlu0 %v527_v4, %s655_s15 }
  0x28   : > { %252 = vrot.lane.b32.xlu0 %v235_v2, %s656_s16 }
  0x72   : > { %v260_v21 = vpop.permute.xlu2 %259 }
  0x92   : > { %v529_v5 = vpop.permute.xlu0 %528 }
  0x93   : > { %v531_v6 = vunpack.i.h.bf16 %v529_v5  ;;  %v530_v7 = vunpack.i.l.bf16 %v529_v5 }
  0x95   : > { %v249_v9 = vsel %vm248_vm0, %v530_v7, %v531_v6  ;;  %v256_v11 = vsel %vm254_vm1, %v235_v2, %v531_v6 }
  0x96   : > { %v255_v10 = vsel %vm254_vm1, 0.0, %v249_v9 }
  0x97   : > { %v532_v12 = vpack.i.bf16 %v256_v11, %v255_v10 }
  0x9a   : > { %v253_v8 = vpop.permute.xlu0 %252 }
  0x9b   : > { %273 = vrot.lane.b32.xlu1 %v253_v8, %s657_s17 }
  0xa3   : > { %533 = vrot.lane.b32.xlu1 %v532_v12, %s657_s17 }
 0x10d   : > { %v274_v15 = vpop.permute.xlu1 %273 }
 0x10e   : > { %462 = vmatpush.msk.msra.mxu0 %vm254_vm1, %v274_v15  ;;  %470 = vmatpush.msk.msra.mxu2 %vm254_vm1, %v274_v15 }
 0x115   : > { %v534_v16 = vpop.permute.xlu1 %533 }
 0x116   : > { %v536_v17 = vunpack.i.h.bf16 %v534_v16  ;;  %v535_v18 = vunpack.i.l.bf16 %v534_v16 }
 0x118   : > { %v276_v20 = vsel %vm275_vm2, %v535_v18, %v536_v17 }
 0x119   : > { %302 = vmatpush.msra.mxu0 %v276_v20  ;;  %471 = vmatpush.msra.mxu2 %v276_v20 }
 0x11a   : > { %463 = vmatmul.msk.f32.vlgmr.msra.gmra.mxu0 %vm278_vm3, %v236_v19  ;;  %464 = vmatmul.msk.f32.vlgmr.msra.gmra.mxu2 %vm278_vm3, %v237_v33 }
 0x197   : > { %v304_v22 = vpop.f32.mrf.mxu0 }
 0x198   : > { %v305_v23 = vadd.f32 %v304_v22, %v260_v21 }
 0x19a   : > { %318 = vrot.lane.b32.xlu0 %v305_v23, %s656_s16  ;;  %v538_v24 = vpack.i.bf16 %v305_v23, %v654_v0 }
 0x19c   : > { %539 = vrot.lane.b32.xlu2 %v538_v24, %s655_s15 }
 0x19d   : > { %v307_v45 = vpop.f32.mrf.mxu2 }
 0x1a2   : > { %327 = vrot.lane.b32.xlu0 %v305_v23, %s657_s17 }
 0x1f6   : > { %v540_v25 = vpop.permute.xlu2 %539 }
 0x1f7   : > { %v542_v26 = vunpack.i.h.bf16 %v540_v25  ;;  %v541_v29 = vunpack.i.l.bf16 %v540_v25 }
 0x1f9   : > { %v548_v27 = vpack.i.bf16 0.0, %v542_v26  ;;  %v317_v31 = vsel %vm248_vm0, %v541_v29, %v542_v26 }
 0x1fb   : > { %549 = vrot.lane.b32.xlu2 %v548_v27, %s657_s17 }
 0x203   : > { %322 = vperm.xlu2 %537, %v311_v28  }
 0x20c   : > { %v319_v30 = vpop.permute.xlu0 %318 }
 0x20d   : > { %v543_v32 = vpack.i.bf16 %v317_v31, %v319_v30 }
 0x20f   : > { %544 = vrot.lane.b32.xlu1 %v543_v32, %s657_s17  ;;  %s378_s17 = scalar_lea.hbm %s814_s5, %s467_s14 }
 0x210   : > { %s382_s26 = sshll.u32 %s378_s17, 4  ;;  %s383_s26 = int_to_ptr.hbm [resolvable:$true] %s382_s26 }
 0x211   : > { %s599_s30 = sshra.s32 %s383_s26, 4  ;;  %s600_s30 = int_to_ptr.hbm [resolvable:$true] %s599_s30 }
 0x212   : > { %s601_s6 = scalar_lea.hbm %s600_s30, 8  ;;  %p606_p3 = scmp.lt.s32.totalorder %s600_s30, %s814_s5 }
 0x213   : > { %p602_p0 = scmp.ne.s32.totalorder %s600_s30, %s601_s6  ;;  %p607_p4 = scmp.lt.s32.totalorder %s605_s9, %s601_s6 }
 0x214   : > { %v328_v42 = vpop.permute.xlu0 %327 }
 0x215   : > { %p603_p1 = pnand %p602_p0, %p727_p5  ;;  %p608_p7 = por %p607_p4, %p606_p3 }
 0x217   : > { %264 = vperm.xlu1 %553, %v239_v34   ;;  %p604_p2 = pneg %p603_p1 }
 0x219   : > { %p609_p8 = pnand %p608_p7, %p604_p2 }
 0x255   : > { %v550_v35 = vpop.permute.xlu2 %549 }
 0x256   : > { %v551_v37 = vunpack.i.l.bf16 %v550_v35  ;;  %v552_v40 = vunpack.i.h.bf16 %v550_v35 }
 0x258   : > { %v335_v44 = vsel %vm275_vm2, %v552_v40, %v328_v42 }
 0x25d   : > { %v323_v48 = vpop.permute.xlu2 %322 }
 0x281   : > { %v545_v36 = vpop.permute.xlu1 %544 }
 0x282   : > { %v547_v38 = vunpack.i.h.bf16 %v545_v36  ;;  %v546_v39 = vunpack.i.l.bf16 %v545_v36 }
 0x284   : > { %357 = vmatpush.msra.mxu1 %v546_v39  ;;  %v336_v41 = vsel %vm275_vm2, %v547_v38, %v551_v37 }
 0x286   : > { %358 = vmatpush.msra.mxu1 %v336_v41 }
 0x288   : > { %359 = vmatpush.msra.mxu1 %v335_v44 }
 0x289   : > { %465 = vmatmul.msk.f32.vlgmr.msra.gmra.mxu1 %vm340_vm4, %v310_v43  ;;  %v265_v46 = vpop.permute.xlu1 %264 }
 0x28a   : > { %v308_v47 = vadd.f32 %v307_v45, %v265_v46 }
 0x306   : > { %v361_v49 = vpop.f32.mrf.mxu1 }
 0x307   : > { %v362_v50 = vadd.f32 %v361_v49, %v323_v48 }
 0x309   : > { %v364_v51 = vadd.f32 %v362_v50, %v308_v47 }
 0x30b   : > { %366 = vst.msk [vmem:[%s230_s23] sm:$0xff] %vm365_vm5, %v364_v51 }
 0x30c   : > { %612 = shalt.err (!%p609_p8)
}
 0x30d   : > { %476 = dma.vmem_to_hbm [thread:$0]  (%p727_p5), %s381_s25, 128, %s383_s26, %s368_s22  }
 0x30e PF: > { %p488_p9 = scmp.ge.s32.totalorder %s651_s21, 2  ;;  %s394_s12 = sand.u32 1, %s639_s18  }
 0x30f   : > { %s395_s13 = scalar_lea.sflag [#allocation4], %s394_s12 }
 0x310   : > { %p483_p10 = pnand %p488_p9, %p731_p6 }
 0x312   : > { %p484_p11 = pneg %p483_p10 }
 0x314   : > { %634 = dma.done.wait (%p484_p11), %s395_s13, 128  }
 0x315   : > { %636 = vsyncadd (%p484_p11), %s395_s13, 4294967168  ;;  %p16_p12 = scmp.ge.s32.totalorder %s714_s24, 4   ;;  %s817_s18 = smov %s643_s19 }
 0x316   : > { %s818_s19 = smov %s647_s20  ;;  %s819_s20 = smov %s725_s27 }
 0x317   : > { %s820_s21 = smov %s714_s24  ;;  %18 = sbr.rel (!%p16_p12) target bundleno = 4 (0x4), region = 80 }
 0x31c   :  { %401 = vsyncpa [#allocation3], 1 }
 0x31d   :  { %403 = vsyncpa [#allocation3 + $0x1], 1 }
 0x31e   :  { %404 = vsyncpa [#allocation4], 1 }
 0x31f   :  { %406 = vsyncpa [#allocation4 + $0x1], 1 }

</bundles_post_ra>
